<compile_context>
chip_gen: v7x
topology: tpu7x:2x2x1
jax: 0.10.0
libtpu: 0.0.40
codegen_flags: <defaults>
</compile_context>

<pallas_src>
import jax
import jax.numpy as jnp
from jax import lax
from jax.experimental import pallas as pl
from jax.experimental.pallas import tpu as pltpu

# Symplectic integrator coefficients (velocity-Verlet / leapfrog scheme).
C_COEFFS = (0.0, 1.0)
D_COEFFS = (0.5, 0.5)
SPRING_K = 1.5  # harmonic-oscillator experiment constant


def _cd_sweep(q, p, inv_m, dt):
    """One unrolled SymplecticSolver.base coefficient sweep (pure VPU work).

    Per-step scalars c*dt and (-k*d)*dt are formed once on the scalar unit;
    every vector update is then a scalar splat + vmul(+vmul) + vadd.
    """
    cdts = tuple(c * dt for c in C_COEFFS)
    ddts = tuple((-SPRING_K * d) * dt for d in D_COEFFS)
    for c, d, cdt, ddt in zip(C_COEFFS, D_COEFFS, cdts, ddts):
        if c != 0:                               # static branch (trace time)
            q = q + cdt * (p * inv_m)            # experiment.dq = p/m, shift = id
        if d != 0:
            p = p + ddt * q                      # experiment.dp = -k*q
    return q, p


# ----------------------------------------------------------------------------
# Single forward step (SymplecticSolver.forward)
# ----------------------------------------------------------------------------
def _step_kernel(dt_ref, q_ref, p_ref, m_ref, q_out, p_out):
    dt = dt_ref[0]                    # SMEM scalar, read once
    inv_m = 1.0 / m_ref[...]          # exact reciprocal
    # NOTE: q/p are fully loaded before any store; required because q_ref/p_ref
    # alias q_out/p_out (input_output_aliases).
    q, p = _cd_sweep(q_ref[...], p_ref[...], inv_m, dt)
    q_out[...] = q
    p_out[...] = p


def symplectic_step(q, p, m, dt):
    """One SymplecticSolver.forward step in a single Pallas kernel.

    Do NOT call this in a host-level time loop -- per-call dispatch and the
    HBM round trips dwarf the compute; use symplectic_trajectory instead.
    """
    dt_arr = jnp.asarray([dt], dtype=q.dtype)
    return pl.pallas_call(
        _step_kernel,
        out_shape=(jax.ShapeDtypeStruct(q.shape, q.dtype),
                   jax.ShapeDtypeStruct(p.shape, p.dtype)),
        in_specs=[
            pl.BlockSpec(memory_space=pltpu.MemorySpace.SMEM),   # dt scalar
            pl.BlockSpec(memory_space=pltpu.MemorySpace.VMEM),   # q
            pl.BlockSpec(memory_space=pltpu.MemorySpace.VMEM),   # p
            pl.BlockSpec(memory_space=pltpu.MemorySpace.VMEM),   # m
        ],
        out_specs=(pl.BlockSpec(memory_space=pltpu.MemorySpace.VMEM),
                   pl.BlockSpec(memory_space=pltpu.MemorySpace.VMEM)),
        # q -> q_out, p -> p_out: in-place state update when the caller donates.
        input_output_aliases={1: 0, 2: 1},
    )(dt_arr, q, p, m)


# ----------------------------------------------------------------------------
# Fused trajectory (BaseSolver.trajectory), one pallas_call for all T steps
# ----------------------------------------------------------------------------
def _make_traj_kernel(steps_per_block, unroll):
    def kernel(dt_ref, q0_ref, p0_ref, m_ref, q_out, p_out,
               q_st, p_st, inv_m_st):
        t_blk = pl.program_id(1)

        @pl.when(t_blk == 0)
        def _():
            # Fresh state per batch tile; experiment.shift(q0) == identity.
            q_st[...] = q0_ref[...]
            p_st[...] = p0_ref[...]
            inv_m_st[...] = 1.0 / m_ref[...]   # exact 1/m, computed once

        inv_m = inv_m_st[...]
        base = t_blk * steps_per_block

        def body(s, carry):
            q, p = carry
            dt = dt_ref[base + s]              # per-step dt from SMEM (scalar unit)
            q, p = _cd_sweep(q, p, inv_m, dt)
            q_out[s] = q.astype(q_out.dtype)   # stream trajectory row (lane-dense)
            p_out[s] = p.astype(p_out.dtype)
            return q, p

        q, p = lax.fori_loop(0, steps_per_block, body,
                             (q_st[...], p_st[...]), unroll=unroll)
        q_st[...] = q                          # carry state to next time block
        p_st[...] = p

    return kernel


def _largest_divisor_leq(n, cap):
    d = max(1, min(cap, n))
    while n % d:
        d -= 1
    return d


def symplectic_trajectory(q0, p0, m, t_grid, *, max_steps_per_block=64,
                          batch_tile=None, out_dtype=None, unroll=8):
    """BaseSolver.trajectory fused into one kernel; returns [T+1, B, F] q/p.

    Row 0 of the output is the initial state: the dt table is prepended with a
    zero entry (a dt=0 sweep is exactly the identity since shift == identity),
    so the kernel writes the full (T+1)-row trajectory directly and no
    host-side concatenate / extra HBM pass is needed.
    """
    B, F = q0.shape
    out_dtype = q0.dtype if out_dtype is None else jnp.dtype(out_dtype)
    dts = (t_grid[1:] - t_grid[:-1]).astype(jnp.float32)
    num_steps = int(dts.shape[0])
    total_rows = num_steps + 1                      # row 0 = initial state

    # Fat time blocks: largest divisor of (T+1) <= cap (no divisibility trap).
    spb = _largest_divisor_leq(total_rows, max_steps_per_block)
    num_tblocks = total_rows // spb
    unroll = max(1, min(unroll, spb))

    if batch_tile is None:
        batch_tile = B
    assert B % batch_tile == 0, "batch_tile must divide batch"
    num_btiles = B // batch_tile

    # dt table with leading zero step -> initial state written as row 0.
    dts_full = jnp.concatenate([jnp.zeros((1,), jnp.float32), dts], axis=0)
    # TODO(synk): for very long trajectories (T >> ~64K steps) the whole-table
    # SMEM residency should be replaced by per-block dt chunks / chunked calls.

    # Explicit VMEM budget: 2 outputs x 2 pipeline buffers x block, 3 inputs x
    # 2 buffers x tile, 3 state scratch slabs.  Cap at 64 MiB (v7x physical).
    out_blk = spb * batch_tile * F * out_dtype.itemsize
    in_blk = batch_tile * F * 4
    budget = 2 * 2 * out_blk + 3 * 2 * in_blk + 3 * in_blk
    vmem_limit = max(32 << 20, min(64 << 20, int(budget * 1.25) + (1 << 20)))

    q_traj, p_traj = pl.pallas_call(
        _make_traj_kernel(spb, unroll),
        out_shape=(jax.ShapeDtypeStruct((total_rows, B, F), out_dtype),
                   jax.ShapeDtypeStruct((total_rows, B, F), out_dtype)),
        grid=(num_btiles, num_tblocks),
        in_specs=[
            pl.BlockSpec(memory_space=pltpu.MemorySpace.SMEM),        # dts [T+1]
            pl.BlockSpec((batch_tile, F), lambda i, t: (i, 0)),       # q0 tile
            pl.BlockSpec((batch_tile, F), lambda i, t: (i, 0)),       # p0 tile
            pl.BlockSpec((batch_tile, F), lambda i, t: (i, 0)),       # m  tile
        ],
        out_specs=(
            pl.BlockSpec((spb, batch_tile, F), lambda i, t: (t, i, 0)),
            pl.BlockSpec((spb, batch_tile, F), lambda i, t: (t, i, 0)),
        ),
        scratch_shapes=[
            pltpu.VMEM((batch_tile, F), jnp.float32),   # q state (lives across time blocks)
            pltpu.VMEM((batch_tile, F), jnp.float32),   # p state
            pltpu.VMEM((batch_tile, F), jnp.float32),   # 1/m
        ],
        compiler_params=pltpu.CompilerParams(
            # batch tiles independent -> megacore-shardable on v7x;
            # time axis carries state sequentially in scratch.
            dimension_semantics=("parallel", "arbitrary"),
            vmem_limit_bytes=vmem_limit),
    )(dts_full, q0, p0, m)
    return q_traj, p_traj


# ----------------------------------------------------------------------------
# Pure-JAX references mirroring the PyTorch semantics
# ----------------------------------------------------------------------------
def symplectic_step_ref(q, p, m, dt):
    for c, d in zip(C_COEFFS, D_COEFFS):
        if c != 0:
            q = q + c * (p / m) * dt
        if d != 0:
            p = p + d * (-SPRING_K * q) * dt
    return q, p


def symplectic_trajectory_ref(q0, p0, m, t_grid):
    dts = t_grid[1:] - t_grid[:-1]
    q, p = q0, p0
    q_traj, p_traj = [q0], [p0]
    for i in range(int(dts.shape[0])):
        q, p = symplectic_step_ref(q, p, m, dts[i])
        q_traj.append(q)
        p_traj.append(p)
    return jnp.stack(q_traj, 0), jnp.stack(p_traj, 0)


# NOTE: kernel multiplies by an exact 1/m while the reference divides by m;
# the ~1 ulp/step difference compounds over the T-step carry but stays well
# inside the 1e-4 tolerance at these sizes.
# TODO(synk): tqdm progress reporting in BaseSolver.trajectory is host-side
# printing and has no kernel equivalent; it is simply dropped.

if __name__ == "__main__":
    key = jax.random.PRNGKey(0)
    kq, kp, km, kt = jax.random.split(key, 4)

    B, F = 64, 128         # widened batch: 8 vregs per vector op fills the VPU
    T = 63                 # 64 trajectory rows -> one fat time block per batch tile
    q0 = jax.random.normal(kq, (B, F), dtype=jnp.float32)
    p0 = jax.random.normal(kp, (B, F), dtype=jnp.float32)
    m = 0.5 + jax.random.uniform(km, (B, F), dtype=jnp.float32)  # positive mass

    # --- single forward step (SymplecticSolver.forward) ---
    dt = 0.1
    q1, p1 = symplectic_step(q0, p0, m, dt)
    jax.block_until_ready((q1, p1))
    q1_ref, p1_ref = symplectic_step_ref(q0, p0, m, dt)
    assert jnp.allclose(q1, q1_ref, rtol=1e-5, atol=1e-5)
    assert jnp.allclose(p1, p1_ref, rtol=1e-5, atol=1e-5)

    # --- fused trajectory (BaseSolver.trajectory), non-uniform dt ---
    step_dts = 0.02 + 0.01 * jax.random.uniform(kt, (T,), dtype=jnp.float32)
    t_grid = jnp.concatenate(
        [jnp.zeros((1,), jnp.float32), jnp.cumsum(step_dts)], axis=0)
    q_traj, p_traj = symplectic_trajectory(
        q0, p0, m, t_grid, max_steps_per_block=64, batch_tile=32)
    jax.block_until_ready((q_traj, p_traj))
    q_traj_ref, p_traj_ref = symplectic_trajectory_ref(q0, p0, m, t_grid)
    assert q_traj.shape == (T + 1, B, F) and p_traj.shape == (T + 1, B, F)
    assert jnp.allclose(q_traj[0], q0) and jnp.allclose(p_traj[0], p0)
    assert jnp.allclose(q_traj, q_traj_ref, rtol=1e-4, atol=1e-4)
    assert jnp.allclose(p_traj, p_traj_ref, rtol=1e-4, atol=1e-4)

    print("KERNEL_OK")
</pallas_src>

<mosaic_0001>
module attributes {stable_mosaic.version = 11 : i64} {
  func.func @_step_kernel(%arg0: memref<1xf32, #tpu.memory_space<smem>>, %arg1: memref<64x128xf32, #tpu.memory_space<vmem>>, %arg2: memref<64x128xf32, #tpu.memory_space<vmem>>, %arg3: memref<64x128xf32, #tpu.memory_space<vmem>>, %arg4: memref<64x128xf32, #tpu.memory_space<vmem>>, %arg5: memref<64x128xf32, #tpu.memory_space<vmem>>) attributes {dimension_semantics = [], scalar_prefetch = 0 : i64, scratch_operands = 0 : i64, tpu.core_type = #tpu.core_type<tc>} {
    %c0 = arith.constant 0 : index
    %0 = memref.load %arg0[%c0] : memref<1xf32, #tpu.memory_space<smem>>
    %c0_0 = arith.constant 0 : index
    %c0_1 = arith.constant 0 : index
    %1 = vector.load %arg3[%c0_0, %c0_1] : memref<64x128xf32, #tpu.memory_space<vmem>>, vector<64x128xf32>
    %cst = arith.constant 1.000000e+00 : f32
    %2 = vector.broadcast %cst : f32 to vector<64x128xf32>
    %3 = arith.divf %2, %1 : vector<64x128xf32>
    %c0_2 = arith.constant 0 : index
    %c0_3 = arith.constant 0 : index
    %4 = vector.load %arg1[%c0_2, %c0_3] : memref<64x128xf32, #tpu.memory_space<vmem>>, vector<64x128xf32>
    %c0_4 = arith.constant 0 : index
    %c0_5 = arith.constant 0 : index
    %5 = vector.load %arg2[%c0_4, %c0_5] : memref<64x128xf32, #tpu.memory_space<vmem>>, vector<64x128xf32>
    %cst_6 = arith.constant 1.000000e+00 : f32
    %6 = arith.mulf %cst_6, %0 : f32
    %cst_7 = arith.constant -7.500000e-01 : f32
    %7 = arith.mulf %cst_7, %0 : f32
    %cst_8 = arith.constant -7.500000e-01 : f32
    %8 = arith.mulf %cst_8, %0 : f32
    %9 = vector.broadcast %7 : f32 to vector<64x128xf32>
    %10 = arith.mulf %9, %4 : vector<64x128xf32>
    %11 = arith.addf %5, %10 : vector<64x128xf32>
    %12 = arith.mulf %11, %3 : vector<64x128xf32>
    %13 = vector.broadcast %6 : f32 to vector<64x128xf32>
    %14 = arith.mulf %13, %12 : vector<64x128xf32>
    %15 = arith.addf %4, %14 : vector<64x128xf32>
    %16 = vector.broadcast %8 : f32 to vector<64x128xf32>
    %17 = arith.mulf %16, %15 : vector<64x128xf32>
    %18 = arith.addf %11, %17 : vector<64x128xf32>
    %c0_9 = arith.constant 0 : index
    %c0_10 = arith.constant 0 : index
    %19 = vector.load %arg4[%c0_9, %c0_10] : memref<64x128xf32, #tpu.memory_space<vmem>>, vector<64x128xf32>
    tpu.vector_store %arg4[%c0_9, %c0_10], %15 {strides = array<i32>} : memref<64x128xf32, #tpu.memory_space<vmem>>, vector<64x128xf32>,
    %c0_11 = arith.constant 0 : index
    %c0_12 = arith.constant 0 : index
    %20 = vector.load %arg5[%c0_11, %c0_12] : memref<64x128xf32, #tpu.memory_space<vmem>>, vector<64x128xf32>
    tpu.vector_store %arg5[%c0_11, %c0_12], %18 {strides = array<i32>} : memref<64x128xf32, #tpu.memory_space<vmem>>, vector<64x128xf32>,
    return
  }
}

</mosaic_0001>

<bundles_post_ra>
// kernel: tpu_custom_call.1
= control target key start
LH: loop header
LB: loop body
LE: loop exit
PB: predicated region body
PF: predicated region fallthrough
CT: control target
= control target key end

     0   :  { %12 = vsyncpa [#allocation4], 0  ;;  %s486_s0 = inlined_call_operand.<no memory space> [shape: f32[1], index: 0, kind: input, shape index: {}]   ;;  %s487_s1 = inlined_call_operand.hbm [shape: f32[64,128], index: 1, kind: input, shape index: {}, may-alias: {1,4}]   ;;  %s488_s2 = inlined_call_operand.hbm [shape: f32[64,128], index: 2, kind: input, shape index: {}, may-alias: {2,5}]   ;;  %s489_s3 = inlined_call_operand.vmem [shape: f32[64,128], index: 3, kind: input, shape index: {}]   ;;  %s490_s4 = inlined_call_operand.hbm [shape: f32[64,128], index: 4, kind: output, shape index: {0}, may-alias: {1,4}]   ;;  %s491_s5 = inlined_call_operand.hbm [shape: f32[64,128], index: 5, kind: output, shape index: {1}, may-alias: {2,5}]  }
   0x1   :  { %13 = vsyncpa [#allocation7], 0 }
   0x2   :  { %14 = vsyncpa [#allocation5], 0 }
   0x3   :  { %15 = vsyncpa [#allocation10], 0  ;;  %s318_s18 = smov [#allocation3]   ;;  %s222_s22 = scalar_lea.hbm %s487_s1, 1024 }
   0x4   :  { %s23_s19 = sshll.u32 %s318_s18, 4  ;;  %p223_p0 = scmp.ne.s32.totalorder %s487_s1, %s222_s22  ;;  %s24_s19 = int_to_ptr.vmem [resolvable:$true] %s23_s19 }
   0x5   :  { %p226_p1 = scmp.lt.u32.totalorder %s222_s22, %s487_s1 }
   0x7   :  { %p228_p2 = pnand %p226_p1, %p223_p0 }
   0x9   :  { %231 = shalt.err (!%p228_p2)
}
   0xa   :  { %s232_s27 = scalar_lea.vmem %s24_s19, 1024  ;;  %p237_p4 = scmp.lt.s32.totalorder %s24_s19, %s24_s19 }
   0xb   :  { %p233_p3 = scmp.ne.s32.totalorder %s24_s19, %s232_s27  ;;  %p238_p5 = scmp.lt.s32.totalorder %s232_s27, %s232_s27 }
   0xd   :  { %p239_p6 = por %p238_p5, %p237_p4 }
   0xf   :  { %p240_p7 = pnand %p239_p6, %p233_p3 }
  0x11   :  { %243 = shalt.err (!%p240_p7)
}
  0x12   :  { %s319_s28 = smov 128   ;;  %s320_s29 = smov 8  }
  0x13   :  { %29 = dma.hbm_to_vmem [thread:$0]  %s487_s1, 1024, %s24_s19, [#allocation4], %s319_s28, %s319_s28, %s320_s29  }
  0x14   :  { %s321_s7 = smov [#allocation6]   ;;  %s244_s11 = scalar_lea.hbm %s488_s2, 1024 }
  0x15   :  { %s35_s8 = sshll.u32 %s321_s7, 4  ;;  %p245_p8 = scmp.ne.s32.totalorder %s488_s2, %s244_s11  ;;  %s36_s8 = int_to_ptr.vmem [resolvable:$true] %s35_s8 }
  0x16   :  { %p248_p9 = scmp.lt.u32.totalorder %s244_s11, %s488_s2 }
  0x18   :  { %p250_p10 = pnand %p248_p9, %p245_p8 }
  0x1a   :  { %253 = shalt.err (!%p250_p10)
}
  0x1b   :  { %s254_s16 = scalar_lea.vmem %s36_s8, 1024  ;;  %p259_p12 = scmp.lt.s32.totalorder %s36_s8, %s36_s8 }
  0x1c   :  { %p255_p11 = scmp.ne.s32.totalorder %s36_s8, %s254_s16  ;;  %p260_p13 = scmp.lt.s32.totalorder %s254_s16, %s254_s16 }
  0x1e   :  { %p261_p0 = por %p260_p13, %p259_p12 }
  0x20   :  { %p262_p1 = pnand %p261_p0, %p255_p11 }
  0x22   :  { %265 = shalt.err (!%p262_p1)
}
  0x23   :  { %41 = dma.hbm_to_vmem [thread:$0]  %s488_s2, 1024, %s36_s8, [#allocation7], %s319_s28, %s319_s28, %s320_s29  }
  0x24   :  { %310 = dma.done.wait [#allocation4], 1024  }
  0x25   :  { %311 = vsyncadd [#allocation4], 4294966272 }
  0x26   :  { %312 = dma.done.wait [#allocation7], 1024  }
  0x27   :  { %313 = vsyncadd [#allocation7], 4294966272  ;;  %s91_s20 = smul.f32 -0.75, %s486_s0  ;;  %v51_v0 = vld [vmem:[%s489_s3] sm:$0xff]  ;;  %v52_v3 = vld [vmem:[%s489_s3 + $0x8] sm:$0xff]  ;;  %v117_v34 = vstv %s486_s0  ;;  %s322_s0 = smov [#allocation8]  }
  0x28   :  { %206 = vrcp.f32 %v51_v0  ;;  %v75_v1 = vld [vmem:[#allocation3] sm:$0xff]  ;;  %v76_v4 = vld [vmem:[#allocation3 + $0x8] sm:$0xff]  ;;  %v53_v5 = vld [vmem:[%s489_s3 + $0x10] sm:$0xff]  ;;  %s171_s14 = sshll.u32 %s322_s0, 4  ;;  %s323_s15 = smov [#allocation9]   ;;  %s172_s14 = int_to_ptr.vmem [resolvable:$true] %s171_s14 }
  0x29   :  { %v390_v2 = vstv %s91_s20  ;;  %208 = vrcp.f32 %v52_v3  ;;  %v77_v6 = vld [vmem:[#allocation3 + $0x10] sm:$0xff]  ;;  %v54_v7 = vld [vmem:[%s489_s3 + $0x18] sm:$0xff]  ;;  %v55_v10 = vld [vmem:[%s489_s3 + $0x20] sm:$0xff]  ;;  %s183_s16 = sshll.u32 %s323_s15, 4  ;;  %s266_s1 = scalar_lea.vmem %s172_s14, 1024  ;;  %s184_s16 = int_to_ptr.vmem [resolvable:$true] %s183_s16 }
  0x2a   :  { %210 = vrcp.f32 %v53_v5  ;;  %v93_v8 = vmul.f32 %v390_v2, %v75_v1  ;;  %v402_v9 = vld [vmem:[#allocation3 + $0x18] sm:$0xff]  ;;  %v83_v11 = vld [vmem:[#allocation6] sm:$0xff]  ;;  %v94_v12 = vmul.f32 %v390_v2, %v76_v4  ;;  %v56_v14 = vld [vmem:[%s489_s3 + $0x28] sm:$0xff]  ;;  %v95_v16 = vmul.f32 %v390_v2, %v77_v6  ;;  %p267_p2 = scmp.ne.s32.totalorder %s172_s14, %s266_s1  ;;  %p271_p3 = scmp.lt.s32.totalorder %s172_s14, %s172_s14 }
  0x2b   :  { %212 = vrcp.f32 %v54_v7  ;;  %v408_v13 = vld [vmem:[#allocation3 + $0x20] sm:$0xff]  ;;  %v84_v15 = vld [vmem:[#allocation6 + $0x8] sm:$0xff]  ;;  %v57_v18 = vld [vmem:[%s489_s3 + $0x30] sm:$0xff]  ;;  %v96_v20 = vmul.f32 %v390_v2, %v402_v9  ;;  %p272_p4 = scmp.lt.s32.totalorder %s266_s1, %s266_s1 }
  0x2c   :  { %214 = vrcp.f32 %v55_v10  ;;  %v414_v17 = vld [vmem:[#allocation3 + $0x28] sm:$0xff]  ;;  %v85_v19 = vld [vmem:[#allocation6 + $0x10] sm:$0xff]  ;;  %v58_v22 = vld [vmem:[%s489_s3 + $0x38] sm:$0xff]  ;;  %v101_v23 = vadd.f32 %v93_v8, %v83_v11  ;;  %v97_v25 = vmul.f32 %v390_v2, %v408_v13  ;;  %v102_v27 = vadd.f32 %v94_v12, %v84_v15 }
  0x2d   :  { %216 = vrcp.f32 %v56_v14  ;;  %v421_v21 = vld [vmem:[#allocation3 + $0x30] sm:$0xff]  ;;  %v86_v24 = vld [vmem:[#allocation6 + $0x18] sm:$0xff]  ;;  %v87_v28 = vld [vmem:[#allocation6 + $0x20] sm:$0xff]  ;;  %v98_v29 = vmul.f32 %v390_v2, %v414_v17  ;;  %v103_v30 = vadd.f32 %v95_v16, %v85_v19  ;;  %p273_p5 = por %p272_p4, %p271_p3 }
  0x2e   :  { %218 = vrcp.f32 %v57_v18  ;;  %v428_v26 = vld [vmem:[#allocation3 + $0x38] sm:$0xff]  ;;  %v88_v31 = vld [vmem:[#allocation6 + $0x28] sm:$0xff]  ;;  %v99_v32 = vmul.f32 %v390_v2, %v421_v21  ;;  %v104_v35 = vadd.f32 %v96_v20, %v86_v24  ;;  %v89_v36 = vld [vmem:[#allocation6 + $0x30] sm:$0xff]  ;;  %v105_v40 = vadd.f32 %v97_v25, %v87_v28 }
  0x2f   :  { %220 = vrcp.f32 %v58_v22  ;;  %v100_v37 = vmul.f32 %v390_v2, %v428_v26  ;;  %v90_v41 = vld [vmem:[#allocation6 + $0x38] sm:$0xff]  ;;  %v106_v44 = vadd.f32 %v98_v29, %v88_v31  ;;  %p274_p6 = pnand %p273_p5, %p267_p2 }
  0x30   :  { %v107_v48 = vadd.f32 %v99_v32, %v89_v36 }
  0x31   :  { %v439_v52 = vadd.f32 %v100_v37, %v90_v41 }
  0x32   :  { %v207_v33 = vpop.eup %206 }
  0x33   :  { %v209_v38 = vpop.eup %208  ;;  %v109_v39 = vmul.f32 %v207_v33, %v101_v23 }
  0x34   :  { %v211_v42 = vpop.eup %210  ;;  %v110_v43 = vmul.f32 %v209_v38, %v102_v27 }
  0x35   :  { %v213_v45 = vpop.eup %212  ;;  %v118_v46 = vmul.f32 %v117_v34, %v109_v39  ;;  %v111_v47 = vmul.f32 %v211_v42, %v103_v30 }
  0x36   :  { %v215_v49 = vpop.eup %214  ;;  %v119_v50 = vmul.f32 %v117_v34, %v110_v43  ;;  %v112_v51 = vmul.f32 %v213_v45, %v104_v35 }
  0x37   :  { %v217_v53 = vpop.eup %216  ;;  %v126_v54 = vadd.f32 %v118_v46, %v75_v1  ;;  %v120_v55 = vmul.f32 %v117_v34, %v111_v47  ;;  %v113_v56 = vmul.f32 %v215_v49, %v105_v40 }
  0x38   :  { %v219_v57 = vpop.eup %218  ;;  %v127_v58 = vadd.f32 %v119_v50, %v76_v4  ;;  %v121_v59 = vmul.f32 %v117_v34, %v112_v51  ;;  %v114_v60 = vmul.f32 %v217_v53, %v106_v44 }
  0x39   :  { %v221_v61 = vpop.eup %220  ;;  %150 = vst [vmem:[#allocation8] sm:$0xff] %v126_v54  ;;  %v128_v62 = vadd.f32 %v120_v55, %v77_v6  ;;  %v122_v63 = vmul.f32 %v117_v34, %v113_v56  ;;  %v115_v0 = vmul.f32 %v219_v57, %v107_v48  ;;  %v134_v3 = vmul.f32 %v126_v54, %v390_v2 }
  0x3a   :  { %151 = vst [vmem:[#allocation8 + $0x8] sm:$0xff] %v127_v58  ;;  %v129_v5 = vadd.f32 %v121_v59, %v402_v9  ;;  %v123_v7 = vmul.f32 %v117_v34, %v114_v60  ;;  %v116_v8 = vmul.f32 %v221_v61, %v439_v52  ;;  %v135_v1 = vmul.f32 %v127_v58, %v390_v2 }
  0x3b   :  { %152 = vst [vmem:[#allocation8 + $0x10] sm:$0xff] %v128_v62  ;;  %v130_v4 = vadd.f32 %v122_v63, %v408_v13  ;;  %v124_v10 = vmul.f32 %v117_v34, %v115_v0  ;;  %v142_v11 = vadd.f32 %v134_v3, %v101_v23  ;;  %v136_v12 = vmul.f32 %v128_v62, %v390_v2 }
  0x3c   :  { %153 = vst [vmem:[#allocation8 + $0x18] sm:$0xff] %v129_v5  ;;  %v131_v6 = vadd.f32 %v123_v7, %v414_v17  ;;  %v125_v14 = vmul.f32 %v117_v34, %v116_v8  ;;  %v143_v15 = vadd.f32 %v135_v1, %v102_v27  ;;  %v137_v9 = vmul.f32 %v129_v5, %v390_v2 }
  0x3d   :  { %154 = vst [vmem:[#allocation8 + $0x20] sm:$0xff] %v130_v4  ;;  %v132_v16 = vadd.f32 %v124_v10, %v421_v21  ;;  %158 = vst [vmem:[#allocation9] sm:$0xff] %v142_v11  ;;  %v144_v18 = vadd.f32 %v136_v12, %v103_v30  ;;  %v138_v13 = vmul.f32 %v130_v4, %v390_v2 }
  0x3e   :  { %155 = vst [vmem:[#allocation8 + $0x28] sm:$0xff] %v131_v6  ;;  %v133_v19 = vadd.f32 %v125_v14, %v428_v26  ;;  %159 = vst [vmem:[#allocation9 + $0x8] sm:$0xff] %v143_v15  ;;  %v145_v20 = vadd.f32 %v137_v9, %v104_v35  ;;  %v139_v22 = vmul.f32 %v131_v6, %v390_v2 }
  0x3f   :  { %156 = vst [vmem:[#allocation8 + $0x30] sm:$0xff] %v132_v16  ;;  %160 = vst [vmem:[#allocation9 + $0x10] sm:$0xff] %v144_v18  ;;  %v146_v17 = vadd.f32 %v138_v13, %v105_v40  ;;  %v140_v23 = vmul.f32 %v132_v16, %v390_v2 }
  0x40   :  { %157 = vst [vmem:[#allocation8 + $0x38] sm:$0xff] %v133_v19  ;;  %161 = vst [vmem:[#allocation9 + $0x18] sm:$0xff] %v145_v20  ;;  %v147_v21 = vadd.f32 %v139_v22, %v106_v44  ;;  %v141_v24 = vmul.f32 %v133_v19, %v390_v2 }
  0x41   :  { %162 = vst [vmem:[#allocation9 + $0x20] sm:$0xff] %v146_v17  ;;  %v148_v25 = vadd.f32 %v140_v23, %v107_v48 }
  0x42   :  { %277 = shalt.err (!%p274_p6)
}
  0x43   :  { %s278_s19 = scalar_lea.hbm %s490_s4, 1024 }
  0x44   :  { %p279_p7 = scmp.ne.s32.totalorder %s490_s4, %s278_s19  ;;  %p282_p8 = scmp.lt.u32.totalorder %s278_s19, %s490_s4 }
  0x46   :  { %p284_p9 = pnand %p282_p8, %p279_p7 }
  0x48   :  { %287 = shalt.err (!%p284_p9)
}
  0x49   :  { %177 = dma.vmem_to_hbm [thread:$0]  %s172_s14, 1024, %s490_s4, [#allocation5], %s319_s28, %s319_s28, %s320_s29   ;;  %163 = vst [vmem:[#allocation9 + $0x28] sm:$0xff] %v147_v21  ;;  %v149_v2 = vadd.f32 %v141_v24, %v439_v52  ;;  %164 = vst [vmem:[#allocation9 + $0x30] sm:$0xff] %v148_v25 }
  0x4a   :  { %s288_s25 = scalar_lea.vmem %s184_s16, 1024  ;;  %p293_p11 = scmp.lt.s32.totalorder %s184_s16, %s184_s16 }
  0x4b   :  { %165 = vst [vmem:[#allocation9 + $0x38] sm:$0xff] %v149_v2  ;;  %p289_p10 = scmp.ne.s32.totalorder %s184_s16, %s288_s25  ;;  %p294_p12 = scmp.lt.s32.totalorder %s288_s25, %s288_s25 }
  0x4d   :  { %p295_p13 = por %p294_p12, %p293_p11 }
  0x4f   :  { %p296_p0 = pnand %p295_p13, %p289_p10 }
  0x51   :  { %299 = shalt.err (!%p296_p0)
}
  0x52   :  { %s300_s30 = scalar_lea.hbm %s491_s5, 1024 }
  0x53   :  { %p301_p1 = scmp.ne.s32.totalorder %s491_s5, %s300_s30  ;;  %p304_p2 = scmp.lt.u32.totalorder %s300_s30, %s491_s5 }
  0x55   :  { %p306_p3 = pnand %p304_p2, %p301_p1 }
  0x57   :  { %309 = shalt.err (!%p306_p3)
}
  0x58   :  { %189 = dma.vmem_to_hbm [thread:$0]  %s184_s16, 1024, %s491_s5, [#allocation10], %s319_s28, %s319_s28, %s320_s29  }
  0x59   :  { %314 = dma.done.wait [#allocation5], 1024  }
  0x5a   :  { %315 = vsyncadd [#allocation5], 4294966272 }
  0x5b   :  { %316 = dma.done.wait [#allocation10], 1024  }
  0x5c   :  { %317 = vsyncadd [#allocation10], 4294966272 }
  0x5d   :  { %196 = vsyncpa [#allocation4], 1 }
  0x5e   :  { %197 = vsyncpa [#allocation7], 1 }
  0x5f   :  { %198 = vsyncpa [#allocation5], 1 }
  0x60   :  { %199 = vsyncpa [#allocation10], 1 }

</bundles_post_ra>
